<compile_context>
chip_gen: v7x
topology: tpu7x:2x2x1
jax: 0.10.0
libtpu: 0.0.40
codegen_flags: <defaults>
</compile_context>

<pallas_src>
import math
import functools

import jax
import jax.numpy as jnp
from jax import lax
from jax.experimental import pallas as pl
from jax.experimental.pallas import tpu as pltpu


_NEG_MASK = -1e30  # finite "-inf" sentinel: avoids inf-inf -> NaN in the online softmax


def _round_up(x, m):
    return (x + m - 1) // m * m


# ---------------------------------------------------------------------------
# Single-block kernel: whole (padded) problem fits one tile.  Plain softmax.
# ---------------------------------------------------------------------------
def _sdpa_single_block_kernel(q_ref, k_ref, v_ref, mask_ref, o_ref):
    # Q already carries the 1/sqrt(D) scale (folded into the padded copy).
    s = lax.dot_general(
        q_ref[...], k_ref[...],
        dimension_numbers=(((1,), (1,)), ((), ())),   # Q @ K^T without an XLU transpose
        preferred_element_type=jnp.float32,
    )
    s = s + mask_ref[...].astype(jnp.float32)
    m = jnp.max(s, axis=-1, keepdims=True)
    p = jnp.exp(s - m)                                 # f32 exp (EUP)
    l = jnp.sum(p, axis=-1, keepdims=True)
    o = jnp.dot(p.astype(v_ref.dtype), v_ref[...], preferred_element_type=jnp.float32)
    o_ref[...] = o / l                                 # exact division (once per tile)


# ---------------------------------------------------------------------------
# Flash (online-softmax) kernel for the tiled path.
# Grid = (M tiles, KV tiles); o_ref is the resident f32 accumulator.
# ---------------------------------------------------------------------------
def _flash_attn_kernel(q_ref, k_ref, v_ref, mask_ref, o_ref, m_sc, l_sc):
    kv = pl.program_id(1)

    @pl.when(kv == 0)
    def _init():
        m_sc[...] = jnp.full_like(m_sc, -jnp.inf)
        l_sc[...] = jnp.zeros_like(l_sc)
        o_ref[...] = jnp.zeros_like(o_ref)

    s = lax.dot_general(
        q_ref[...], k_ref[...],
        dimension_numbers=(((1,), (1,)), ((), ())),
        preferred_element_type=jnp.float32,
    )                                                   # (tile_m, tile_n), f32
    s = s + mask_ref[...].astype(jnp.float32)

    m_prev = m_sc[...]
    m_new = jnp.maximum(m_prev, jnp.max(s, axis=-1, keepdims=True))
    alpha = jnp.exp(m_prev - m_new)
    p = jnp.exp(s - m_new)                              # f32 exp; cast only for the MXU
    l_sc[...] = alpha * l_sc[...] + jnp.sum(p, axis=-1, keepdims=True)
    o_ref[...] = alpha * o_ref[...] + jnp.dot(
        p.astype(v_ref.dtype), v_ref[...], preferred_element_type=jnp.float32)
    m_sc[...] = m_new

    @pl.when(kv == pl.num_programs(1) - 1)
    def _finalize():
        denom = jnp.maximum(l_sc[...], 1e-30)           # guard fully-masked rows
        o_ref[...] = o_ref[...] / denom                 # exact division, once per M tile


# ---------------------------------------------------------------------------
# Wrapper: pads to lane-dense shapes, folds the scale into Q, dispatches.
# ---------------------------------------------------------------------------
@functools.partial(jax.jit, static_argnames=("tile_m", "tile_n", "compute_dtype"))
def sdpa_pallas(query, key, value, attention_mask, *,
                tile_m=256, tile_n=256, compute_dtype=jnp.bfloat16):
    M, D = query.shape
    N, Dk = key.shape
    Nv, Dv = value.shape
    assert Dk == D and Nv == N and attention_mask.shape == (M, N)

    scale = 1.0 / math.sqrt(D)            # uses the ORIGINAL head dim, not the padded one
    f32 = jnp.float32
    cdt = compute_dtype

    single_block = (M <= tile_m) and (N <= tile_n)
    if single_block:
        M_p = _round_up(M, 8)
        N_p = _round_up(N, 128)
    else:
        M_p = _round_up(M, tile_m)
        N_p = _round_up(N, tile_n)
    D_p = _round_up(D, 128)
    Dv_p = _round_up(Dv, 128)

    # 1/sqrt(D) folded into the padded Q copy (fuses with the pad under jit).
    q_p = jnp.zeros((M_p, D_p), cdt).at[:M, :D].set(
        (query.astype(f32) * scale).astype(cdt))
    k_p = jnp.zeros((N_p, D_p), cdt).at[:N, :D].set(key.astype(cdt))
    v_p = jnp.zeros((N_p, Dv_p), cdt).at[:N, :Dv].set(value.astype(cdt))

    # Additive mask: clamp user -inf to a finite sentinel; padded key columns masked;
    # padded query rows see zeros over real keys so their (discarded) rows stay finite.
    # Stored in compute_dtype -> halves the dominant O(M*N) HBM stream in bf16.
    mask = jnp.maximum(attention_mask.astype(f32), _NEG_MASK)
    mask_p = jnp.full((M_p, N_p), _NEG_MASK, cdt)
    mask_p = mask_p.at[:, :N].set(0.0)
    mask_p = mask_p.at[:M, :N].set(mask.astype(cdt))

    if single_block:
        out_p = pl.pallas_call(
            _sdpa_single_block_kernel,
            out_shape=jax.ShapeDtypeStruct((M_p, Dv_p), f32),
        )(q_p, k_p, v_p, mask_p)
    else:
        grid = (M_p // tile_m, N_p // tile_n)
        out_p = pl.pallas_call(
            _flash_attn_kernel,
            out_shape=jax.ShapeDtypeStruct((M_p, Dv_p), f32),
            grid_spec=pltpu.PrefetchScalarGridSpec(
                num_scalar_prefetch=0,
                grid=grid,
                in_specs=[
                    pl.BlockSpec((tile_m, D_p), lambda i, j: (i, 0)),     # Q (resident)
                    pl.BlockSpec((tile_n, D_p), lambda i, j: (j, 0)),     # K
                    pl.BlockSpec((tile_n, Dv_p), lambda i, j: (j, 0)),    # V
                    pl.BlockSpec((tile_m, tile_n), lambda i, j: (i, j)),  # additive mask
                ],
                out_specs=pl.BlockSpec((tile_m, Dv_p), lambda i, j: (i, 0)),  # accumulator
                scratch_shapes=[
                    pltpu.VMEM((tile_m, 1), jnp.float32),   # running max
                    pltpu.VMEM((tile_m, 1), jnp.float32),   # running sum
                ],
            ),
            compiler_params=pltpu.CompilerParams(
                dimension_semantics=("parallel", "arbitrary"),
            ),
        )(q_p, k_p, v_p, mask_p)

    return out_p[:M, :Dv].astype(query.dtype)


def sdpa_reference(query, key, value, attention_mask):
    qk = jnp.matmul(query, key.T) / math.sqrt(query.shape[-1])
    qk = qk + attention_mask
    attn = jax.nn.softmax(qk, axis=-1)
    return jnp.matmul(attn, value)


if __name__ == "__main__":
    rng = jax.random.PRNGKey(0)

    # ---- Case 1: the module's literal tiny shapes -> single-block fast path.
    # (The original script's value shape (5, 7) is inconsistent with key (4, 5);
    #  the matmul requires value of shape (4, 7).)
    M, N, D, Dv = 3, 4, 5, 7
    k1, k2, k3, rng = jax.random.split(rng, 4)
    q_s = jax.random.normal(k1, (M, D), dtype=jnp.float32)
    k_s = jax.random.normal(k2, (N, D), dtype=jnp.float32)
    v_s = jax.random.normal(k3, (N, Dv), dtype=jnp.float32)
    mask_s = jnp.zeros((M, N), dtype=jnp.float32)
    ref_s = sdpa_reference(q_s, k_s, v_s, mask_s)

    out_f32 = jax.block_until_ready(
        sdpa_pallas(q_s, k_s, v_s, mask_s, compute_dtype=jnp.float32))
    assert out_f32.shape == (M, Dv)
    assert jnp.allclose(out_f32, ref_s, atol=2e-3, rtol=2e-3), "tiny f32 mismatch"

    out_bf16 = jax.block_until_ready(sdpa_pallas(q_s, k_s, v_s, mask_s))  # bf16 MXU path
    assert jnp.allclose(out_bf16, ref_s, atol=5e-2, rtol=5e-2), "tiny bf16 mismatch"

    # ---- Case 2: multi-tile shapes with a nontrivial mask -> flash (online-softmax) path.
    M2, N2, D2, Dv2 = 256, 384, 64, 64
    k1, k2, k3, k4, rng = jax.random.split(rng, 5)
    q_l = jax.random.normal(k1, (M2, D2), dtype=jnp.float32)
    k_l = jax.random.normal(k2, (N2, D2), dtype=jnp.float32)
    v_l = jax.random.normal(k3, (N2, Dv2), dtype=jnp.float32)
    lengths = jax.random.randint(k4, (M2, 1), 1, N2 + 1)
    cols = jnp.arange(N2)[None, :]
    mask_l = jnp.where(cols < lengths, 0.0, -1e9).astype(jnp.float32)
    ref_l = sdpa_reference(q_l, k_l, v_l, mask_l)

    out_l_f32 = jax.block_until_ready(
        sdpa_pallas(q_l, k_l, v_l, mask_l, tile_m=128, tile_n=128,
                    compute_dtype=jnp.float32))
    assert jnp.allclose(out_l_f32, ref_l, atol=2e-3, rtol=2e-3), "flash f32 mismatch"

    out_l_bf16 = jax.block_until_ready(
        sdpa_pallas(q_l, k_l, v_l, mask_l, tile_m=128, tile_n=128))
    assert jnp.allclose(out_l_bf16, ref_l, atol=5e-2, rtol=5e-2), "flash bf16 mismatch"

    print("KERNEL_OK")
</pallas_src>

<mosaic_0001>
module attributes {stable_mosaic.version = 11 : i64} {
  func.func @_sdpa_single_block_kernel(%arg0: memref<8x128xf32, #tpu.memory_space<vmem>>, %arg1: memref<128x128xf32, #tpu.memory_space<vmem>>, %arg2: memref<128x128xf32, #tpu.memory_space<vmem>>, %arg3: memref<8x128xf32, #tpu.memory_space<vmem>>, %arg4: memref<8x128xf32, #tpu.memory_space<vmem>>) attributes {dimension_semantics = [], scalar_prefetch = 0 : i64, scratch_operands = 0 : i64, tpu.core_type = #tpu.core_type<tc>} {
    %c0 = arith.constant 0 : index
    %c0_0 = arith.constant 0 : index
    %0 = vector.load %arg0[%c0, %c0_0] : memref<8x128xf32, #tpu.memory_space<vmem>>, vector<8x128xf32>
    %c0_1 = arith.constant 0 : index
    %c0_2 = arith.constant 0 : index
    %1 = vector.load %arg1[%c0_1, %c0_2] : memref<128x128xf32, #tpu.memory_space<vmem>>, vector<128x128xf32>
    %cst = arith.constant dense<0.000000e+00> : vector<8x128xf32>
    %2 = tpu.matmul %0, %1, %cst {dimension_numbers = #tpu.dot_dimension_numbers<[1], [1], [0], [0], [0, 0, 1, 0], [], []>} : vector<8x128xf32>, vector<128x128xf32>, vector<8x128xf32> -> vector<8x128xf32>
    %c0_3 = arith.constant 0 : index
    %c0_4 = arith.constant 0 : index
    %3 = vector.load %arg3[%c0_3, %c0_4] : memref<8x128xf32, #tpu.memory_space<vmem>>, vector<8x128xf32>
    %4 = arith.addf %2, %3 : vector<8x128xf32>
    %cst_5 = arith.constant dense<0xFF800000> : vector<8xf32>
    %5 = vector.multi_reduction <maximumf>, %4, %cst_5 [1] : vector<8x128xf32> to vector<8xf32>
    %6 = vector.shape_cast %5 : vector<8xf32> to vector<8x1xf32>
    %7 = vector.broadcast %6 : vector<8x1xf32> to vector<8x128xf32>
    %8 = arith.subf %4, %7 : vector<8x128xf32>
    %9 = math.exp %8 : vector<8x128xf32>
    %cst_6 = arith.constant dense<0.000000e+00> : vector<8xf32>
    %10 = vector.multi_reduction <add>, %9, %cst_6 [1] : vector<8x128xf32> to vector<8xf32>
    %11 = vector.shape_cast %10 : vector<8xf32> to vector<8x1xf32>
    %c0_7 = arith.constant 0 : index
    %c0_8 = arith.constant 0 : index
    %12 = vector.load %arg2[%c0_7, %c0_8] : memref<128x128xf32, #tpu.memory_space<vmem>>, vector<128x128xf32>
    %cst_9 = arith.constant dense<0.000000e+00> : vector<8x128xf32>
    %13 = tpu.matmul %9, %12, %cst_9 {dimension_numbers = #tpu.dot_dimension_numbers<[1], [0], [0], [1], [0, 0, 1, 1], [], []>} : vector<8x128xf32>, vector<128x128xf32>, vector<8x128xf32> -> vector<8x128xf32>
    %14 = vector.broadcast %11 : vector<8x1xf32> to vector<8x128xf32>
    %15 = arith.divf %13, %14 : vector<8x128xf32>
    %c0_10 = arith.constant 0 : index
    %c0_11 = arith.constant 0 : index
    %16 = vector.load %arg4[%c0_10, %c0_11] : memref<8x128xf32, #tpu.memory_space<vmem>>, vector<8x128xf32>
    tpu.vector_store %arg4[%c0_10, %c0_11], %15 {strides = array<i32>} : memref<8x128xf32, #tpu.memory_space<vmem>>, vector<8x128xf32>,
    return
  }
}

</mosaic_0001>

<bundles_post_ra>
// kernel: sdpa_pallas.1
= control target key start
LH: loop header
LB: loop body
LE: loop exit
PB: predicated region body
PF: predicated region fallthrough
CT: control target
= control target key end

     0   :  { %v364_v0 = vmov 0.0|0.0   ;;  %vm365_vm0 = vmmov 0   ;;  %v366_v3 = vmov 0.0   ;;  %s513_s1 = inlined_call_operand.vmem [shape: f32[128,128], index: 1, kind: input, shape index: {}]   ;;  %s514_s0 = inlined_call_operand.vmem [shape: f32[8,128], index: 0, kind: input, shape index: {}]   ;;  %s515_s2 = inlined_call_operand.vmem [shape: f32[128,128], index: 2, kind: input, shape index: {}]   ;;  %s516_s3 = inlined_call_operand.vmem [shape: f32[8,128], index: 3, kind: input, shape index: {}]   ;;  %s517_s4 = inlined_call_operand.vmem [shape: f32[8,128], index: 4, kind: output, shape index: {}]  }
   0x1   :  { %309 = vmatprep.subr.bf16.mxu0 %v364_v0  ;;  %v18_v1 = vld [vmem:[%s513_s1] sm:$0xff]  ;;  %v19_v2 = vld [vmem:[%s513_s1 + $0x8] sm:$0xff]  ;;  %271 = vmatprep.mubr.msk.f32.mxu0 %vm365_vm0, %v366_v3  ;;  %v20_v5 = vld [vmem:[%s513_s1 + $0x10] sm:$0xff] }
   0x2   :  { %v310_v4 = vpack.c.bf16 %v19_v2, %v18_v1  ;;  %333 = vmatprep.subr.bf16.mxu1 %v364_v0  ;;  %306 = vmatprep.mubr.msk.f32.mxu1 %vm365_vm0, %v366_v3  ;;  %v21_v6 = vld [vmem:[%s513_s1 + $0x18] sm:$0xff]  ;;  %v22_v8 = vld [vmem:[%s513_s1 + $0x20] sm:$0xff]  ;;  %v23_v9 = vld [vmem:[%s513_s1 + $0x28] sm:$0xff] }
   0x3   :  { %v313_v7 = vpack.c.bf16 %v21_v6, %v20_v5  ;;  %v316_v10 = vpack.c.bf16 %v23_v9, %v22_v8  ;;  %v24_v11 = vld [vmem:[%s513_s1 + $0x30] sm:$0xff]  ;;  %v25_v12 = vld [vmem:[%s513_s1 + $0x38] sm:$0xff]  ;;  %v26_v14 = vld [vmem:[%s513_s1 + $0x40] sm:$0xff] }
   0x4   :  { %311 = vmatpush3.bf16.xpose.msra.mxu0 %v310_v4  ;;  %v319_v13 = vpack.c.bf16 %v25_v12, %v24_v11  ;;  %v27_v15 = vld [vmem:[%s513_s1 + $0x48] sm:$0xff]  ;;  %v28_v17 = vld [vmem:[%s513_s1 + $0x50] sm:$0xff]  ;;  %v29_v18 = vld [vmem:[%s513_s1 + $0x58] sm:$0xff] }
   0x5   :  { %312 = vmatprep.subr.bf16.mxu0 %v364_v0  ;;  %v322_v16 = vpack.c.bf16 %v27_v15, %v26_v14  ;;  %v325_v19 = vpack.c.bf16 %v29_v18, %v28_v17  ;;  %v30_v20 = vld [vmem:[%s513_s1 + $0x60] sm:$0xff]  ;;  %v31_v21 = vld [vmem:[%s513_s1 + $0x68] sm:$0xff]  ;;  %v32_v23 = vld [vmem:[%s513_s1 + $0x70] sm:$0xff] }
   0x6   :  { %v328_v22 = vpack.c.bf16 %v31_v21, %v30_v20  ;;  %v33_v24 = vld [vmem:[%s513_s1 + $0x78] sm:$0xff]  ;;  %v17_v26 = vld [vmem:[%s514_s0] sm:$0xff]  ;;  %v113_v28 = vld [vmem:[%s515_s2 + $0x8] sm:$0xff] }
   0x7   :  { %v331_v25 = vpack.c.bf16 %v33_v24, %v32_v23  ;;  %v112_v27 = vld [vmem:[%s515_s2] sm:$0xff]  ;;  %v114_v29 = vld [vmem:[%s515_s2 + $0x10] sm:$0xff]  ;;  %v115_v31 = vld [vmem:[%s515_s2 + $0x18] sm:$0xff] }
   0x8   :  { %v334_v30 = vpack.c.bf16 %v113_v28, %v112_v27  ;;  %v337_v32 = vpack.c.bf16 %v115_v31, %v114_v29  ;;  %v116_v33 = vld [vmem:[%s515_s2 + $0x20] sm:$0xff]  ;;  %v117_v34 = vld [vmem:[%s515_s2 + $0x28] sm:$0xff]  ;;  %v118_v36 = vld [vmem:[%s515_s2 + $0x30] sm:$0xff] }
   0x9   :  { %v340_v35 = vpack.c.bf16 %v117_v34, %v116_v33  ;;  %v119_v37 = vld [vmem:[%s515_s2 + $0x38] sm:$0xff]  ;;  %v34_v39 = vld [vmem:[%s516_s3] sm:$0xff]  ;;  %v121_v44 = vld [vmem:[%s515_s2 + $0x48] sm:$0xff] }
   0xa   :  { %335 = vmatpush3.bf16.msra.mxu1 %v334_v30  ;;  %v343_v38 = vpack.c.bf16 %v119_v37, %v118_v36  ;;  %v120_v43 = vld [vmem:[%s515_s2 + $0x40] sm:$0xff]  ;;  %v122_v46 = vld [vmem:[%s515_s2 + $0x50] sm:$0xff]  ;;  %v123_v47 = vld [vmem:[%s515_s2 + $0x58] sm:$0xff] }
   0xb   :  { %336 = vmatprep.subr.bf16.mxu1 %v364_v0  ;;  %v346_v45 = vpack.c.bf16 %v121_v44, %v120_v43  ;;  %v349_v48 = vpack.c.bf16 %v123_v47, %v122_v46  ;;  %v124_v49 = vld [vmem:[%s515_s2 + $0x60] sm:$0xff]  ;;  %v125_v50 = vld [vmem:[%s515_s2 + $0x68] sm:$0xff]  ;;  %v126_v52 = vld [vmem:[%s515_s2 + $0x70] sm:$0xff] }
   0xc   :  { %314 = vmatpush3.bf16.xpose.msra.mxu0 %v313_v7  ;;  %v352_v51 = vpack.c.bf16 %v125_v50, %v124_v49  ;;  %v127_v53 = vld [vmem:[%s515_s2 + $0x78] sm:$0xff] }
   0xd   :  { %315 = vmatprep.subr.bf16.mxu0 %v364_v0  ;;  %v355_v54 = vpack.c.bf16 %v127_v53, %v126_v52 }
   0xe   :  { %338 = vmatpush3.bf16.msra.mxu1 %v337_v32 }
   0xf   :  { %339 = vmatprep.subr.bf16.mxu1 %v364_v0 }
  0x12   :  { %341 = vmatpush3.bf16.msra.mxu1 %v340_v35 }
  0x13   :  { %342 = vmatprep.subr.bf16.mxu1 %v364_v0 }
  0x14   :  { %317 = vmatpush3.bf16.xpose.msra.mxu0 %v316_v10 }
  0x15   :  { %318 = vmatprep.subr.bf16.mxu0 %v364_v0 }
  0x16   :  { %344 = vmatpush3.bf16.msra.mxu1 %v343_v38 }
  0x17   :  { %345 = vmatprep.subr.bf16.mxu1 %v364_v0 }
  0x1a   :  { %347 = vmatpush3.bf16.msra.mxu1 %v346_v45 }
  0x1b   :  { %348 = vmatprep.subr.bf16.mxu1 %v364_v0 }
  0x1c   :  { %320 = vmatpush3.bf16.xpose.msra.mxu0 %v319_v13 }
  0x1d   :  { %321 = vmatprep.subr.bf16.mxu0 %v364_v0 }
  0x1e   :  { %350 = vmatpush3.bf16.msra.mxu1 %v349_v48 }
  0x1f   :  { %351 = vmatprep.subr.bf16.mxu1 %v364_v0 }
  0x22   :  { %353 = vmatpush3.bf16.msra.mxu1 %v352_v51 }
  0x23   :  { %354 = vmatprep.subr.bf16.mxu1 %v364_v0 }
  0x24   :  { %323 = vmatpush3.bf16.xpose.msra.mxu0 %v322_v16 }
  0x25   :  { %324 = vmatprep.subr.bf16.mxu0 %v364_v0 }
  0x26   :  { %356 = vmatpush3.bf16.msra.mxu1 %v355_v54 }
  0x2c   :  { %326 = vmatpush3.bf16.xpose.msra.mxu0 %v325_v19 }
  0x2d   :  { %327 = vmatprep.subr.bf16.mxu0 %v364_v0 }
  0x34   :  { %329 = vmatpush3.bf16.xpose.msra.mxu0 %v328_v22 }
  0x35   :  { %330 = vmatprep.subr.bf16.mxu0 %v364_v0 }
  0x3c   :  { %332 = vmatpush3.bf16.xpose.msra.mxu0 %v331_v25 }
  0x43   :  { %272 = vmatmul.mubr.f32.vlgmr.msra.gmra.mrb[0].mxu0 %v17_v26 }
 0x116   :  { %v101_v40 = vpop.f32.mrb[0].mxu0 }
 0x117   :  { %v102_v41 = vadd.f32 %v101_v40, %v34_v39  ;;  %v273_v42 = vpop.f32.mrb[1].mxu0 }
 0x119   :  { %105 = vmax.xlane.f32.xlu0 %v102_v41 }
 0x1a6   :  { %v106_v55 = vpop.xlane.xlu0 %105 }
 0x1a7   :  { %v107_v56 = vsub.f32 %v102_v41, %v106_v55 }
 0x1a9   :  { %v108_v57 = vmul.f32 1.442695, %v107_v56 }
 0x1ab   :  { %360 = vpow2.f32 %v108_v57 }
 0x1b5   :  { %v361_v58 = vpop.eup %360 }
 0x1b6   :  { %110 = vadd.xlane.f32.xlu0 %v361_v58  ;;  %307 = vmatmul.mubr.f32.vlgmr.msra.gmra.mrb[0].mxu1 %v361_v58 }
 0x243   :  { %v111_v59 = vpop.xlane.xlu0 %110 }
 0x244   :  { %362 = vrcp.f32 %v111_v59 }
 0x24e   :  { %v363_v60 = vpop.eup %362 }
 0x289   :  { %v194_v61 = vpop.f32.mrb[0].mxu1 }
 0x28a   :  { %v199_v62 = vmul.f32 %v363_v60, %v194_v61  ;;  %v308_v63 = vpop.f32.mrb[1].mxu1 }
 0x28c   :  { %200 = vst [vmem:[%s517_s4] sm:$0xff] %v199_v62 }

</bundles_post_ra>
